<compile_context>
chip_gen: v5e
topology: v5e:2x2
jax: 0.10.0
libtpu: 0.0.40
codegen_flags: <defaults>
</compile_context>

<pallas_src>
import functools

import jax
import jax.numpy as jnp
from jax.experimental import pallas as pl
from jax.experimental.pallas import tpu as pltpu

_LANES = 128
# Roll-wraparound invariant: lanes 0,1 (mod 4) only consume roll(-2) values and
# lanes 2,3 only consume roll(+2) values, which only holds because the row
# width is a multiple of 4.  Do not change _LANES without revisiting the rolls.
assert _LANES % 4 == 0


def _make_kernel(convert: bool):
    """Kernel with only the convert flag static; 1/W, 1/H come from SMEM."""

    def kernel(scale_ref, b_ref, o_ref):
        # scale_ref: (2,) f32 in SMEM = [1/W, 1/H]; b_ref/o_ref: (br, 128) f32 VMEM.
        b = b_ref[...]
        lane = jax.lax.broadcasted_iota(jnp.int32, b.shape, 1) % 4
        inv_w = scale_ref[0]
        inv_h = scale_ref[1]
        # per-lane scale pattern [1/W, 1/H, 1/W, 1/H, ...]
        scale = jnp.where(lane % 2 == 0, inv_w, inv_h)

        if convert:
            # roll(126) == roll(-2): out[l] = in[l+2]  (x2,y2 land on x1,y1 lanes)
            # roll(+2):              out[l] = in[l-2]  (x1,y1 land on x2,y2 lanes)
            # Wraparound at the 128-lane boundary never feeds a consuming lane
            # because 128 % 4 == 0 (see module-level assert).
            r_ahead = pltpu.roll(b, _LANES - 2, axis=1)
            r_behind = pltpu.roll(b, 2, axis=1)
            # lanes 0,1 (cx,cy) = 0.5*(this + 2-ahead); lanes 2,3 (w,h) = this - 2-behind
            conv = jnp.where(lane < 2, 0.5 * (b + r_ahead), b - r_behind)
        else:
            conv = b

        o_ref[...] = conv * scale

    return kernel


def _round_up(x: int, m: int) -> int:
    return -(-x // m) * m


@functools.partial(jax.jit, static_argnames=("convert", "block_rows"))
def _convert_box_pallas(boxes, scale, *, convert: bool, block_rows: int = 2048):
    """boxes: (N, 4); scale: (2,) f32 = [1/W, 1/H] (traced -> no per-size recompile)."""
    n = boxes.shape[0]
    boxes = boxes.astype(jnp.float32)
    total = 4 * n

    # --- lane-dense repack: (N, 4) -> (rows8, 128) -----------------------------
    flat = boxes.reshape(-1)
    pad_lanes = (-total) % _LANES
    if pad_lanes:
        flat = jnp.pad(flat, (0, pad_lanes))
    rows = (total + pad_lanes) // _LANES
    rows8 = _round_up(rows, 8)              # <= 7 extra rows, keeps (8,128) tiling clean
    x = flat.reshape(rows, _LANES)
    if rows8 != rows:
        x = jnp.pad(x, ((0, rows8 - rows), (0, 0)))
    needs_staging = (pad_lanes != 0) or (rows8 != rows)

    # Block rows: aim for >= 2 grid steps so ("parallel",) can use both v7x TCs,
    # capped at block_rows (1 MiB f32 block -> ~4 MiB double-buffered in+out,
    # safe under v5e's 16 MiB scoped VMEM; raise block_rows to ~8192 on v7x).
    br = min(block_rows, max(8, _round_up(pl.cdiv(rows8, 2), 8)))
    grid = (pl.cdiv(rows8, br),)            # partial last block is masked by Pallas

    out = pl.pallas_call(
        _make_kernel(convert),
        out_shape=jax.ShapeDtypeStruct((rows8, _LANES), jnp.float32),
        grid_spec=pltpu.PrefetchScalarGridSpec(
            num_scalar_prefetch=0,
            grid=grid,
            in_specs=[
                pl.BlockSpec(memory_space=pltpu.MemorySpace.SMEM),   # (2,) scalars
                pl.BlockSpec((br, _LANES), lambda i: (i, 0)),
            ],
            out_specs=pl.BlockSpec((br, _LANES), lambda i: (i, 0)),
        ),
        compiler_params=pltpu.CompilerParams(dimension_semantics=("parallel",)),
        # Reuse the padded staging buffer in place; skip when x would alias the
        # caller's non-donated parameter (XLA would insert a copy).
        input_output_aliases={1: 0} if needs_staging else {},
    )(scale, x)

    # --- unpack back to (N, 4); free view when no staging pad was applied ------
    if needs_staging:
        return out.reshape(-1)[:total].reshape(n, 4)
    return out.reshape(n, 4)


def convert_box_pallas(boxes: jax.Array, inv_w: float, inv_h: float,
                       convert: bool, *, block_rows: int = 2048) -> jax.Array:
    """xyxy->cxcywh (optional) + per-axis normalization on TPU."""
    boxes = jnp.asarray(boxes, jnp.float32)
    if boxes.shape[0] == 0:                 # no boxes -> nothing to do
        return boxes
    scale = jnp.array([inv_w, inv_h], dtype=jnp.float32)
    return _convert_box_pallas(boxes, scale, convert=bool(convert),
                               block_rows=block_rows)


class ConvertBox:
    """JAX/Pallas port of rtdetr's ConvertBox transform.

    NOTE: for production pipelines with tiny per-image N, batch boxes from
    many images into a single convert_box_pallas call (launch overhead
    dominates the ~KB of data); the kernel itself is image-size agnostic, so
    no recompiles occur across different (W, H).
    """

    def __init__(self, out_fmt: str = "", normalize: bool = False) -> None:
        self.out_fmt = out_fmt
        self.normalize = normalize

    def __call__(self, img, target):
        if target is not None and "boxes" in target:
            do_convert = (self.out_fmt == "cxcywh")
            do_norm = self.normalize
            if do_convert or do_norm:
                boxes = jnp.asarray(target["boxes"], jnp.float32)
                if do_norm:
                    h, w = img.shape[-2:]          # NCHW -> (H, W)
                    inv_w, inv_h = 1.0 / float(w), 1.0 / float(h)
                else:
                    inv_w = inv_h = 1.0            # identity scaling
                boxes = convert_box_pallas(boxes, inv_w, inv_h, convert=do_convert)
                target = dict(target)
                target["boxes"] = boxes
        return (img, target) if target is not None else img


# ----------------------------- reference & test ------------------------------

def _reference(boxes, w, h, convert=True, normalize=True):
    boxes = boxes.astype(jnp.float32)
    if convert:
        x1, y1, x2, y2 = boxes[:, 0], boxes[:, 1], boxes[:, 2], boxes[:, 3]
        cx = (x1 + x2) / 2
        cy = (y1 + y2) / 2
        bw = x2 - x1
        bh = y2 - y1
        boxes = jnp.stack([cx, cy, bw, bh], axis=-1)
    if normalize:
        scale = jnp.array([w, h, w, h], dtype=jnp.float32)
        boxes = boxes / scale
    return boxes


def _make_boxes(key, n, w, h):
    k_xy, k_wh = jax.random.split(key)
    xy = jax.random.uniform(k_xy, (n, 2), minval=0.0, maxval=w / 2)
    wh = jax.random.uniform(k_wh, (n, 2), minval=1.0, maxval=w / 2)
    return jnp.concatenate([xy, xy + wh], axis=-1).astype(jnp.float32)


if __name__ == "__main__":
    key = jax.random.PRNGKey(0)
    k_img, k_box, k_big1, k_big2 = jax.random.split(key, 4)

    B, C, H, W = 2, 4, 16, 16
    N = 8  # number of boxes

    img = jax.random.normal(k_img, (B, C, H, W), dtype=jnp.float32)
    boxes_xyxy = _make_boxes(k_box, N, W, H)
    target = {"boxes": boxes_xyxy, "labels": jnp.arange(N, dtype=jnp.int32)}

    # convert + normalize
    transform = ConvertBox(out_fmt="cxcywh", normalize=True)
    out_img, out_target = transform(img, target)
    out_boxes = jax.block_until_ready(out_target["boxes"])
    ref = _reference(boxes_xyxy, W, H, convert=True, normalize=True)
    assert out_boxes.shape == (N, 4) and out_boxes.dtype == jnp.float32
    assert jnp.allclose(out_boxes, ref, atol=1e-5, rtol=1e-5)

    # convert only
    t2 = ConvertBox(out_fmt="cxcywh", normalize=False)
    _, out_t2 = t2(img, dict(target))
    out2 = jax.block_until_ready(out_t2["boxes"])
    ref2 = _reference(boxes_xyxy, W, H, convert=True, normalize=False)
    assert jnp.allclose(out2, ref2, atol=1e-5, rtol=1e-5)

    # normalize only
    t3 = ConvertBox(out_fmt="", normalize=True)
    _, out_t3 = t3(img, dict(target))
    out3 = jax.block_until_ready(out_t3["boxes"])
    ref3 = _reference(boxes_xyxy, W, H, convert=False, normalize=True)
    assert jnp.allclose(out3, ref3, atol=1e-5, rtol=1e-5)

    # different image size (different 1/W, 1/H): exercises the no-recompile SMEM path
    H2, W2 = 24, 32
    img2 = jax.random.normal(k_img, (B, C, H2, W2), dtype=jnp.float32)
    _, out_t4 = transform(img2, dict(target))
    out4 = jax.block_until_ready(out_t4["boxes"])
    ref4 = _reference(boxes_xyxy, W2, H2, convert=True, normalize=True)
    assert jnp.allclose(out4, ref4, atol=1e-5, rtol=1e-5)

    # larger, lane-aligned N (4*N % 128 == 0, rows % 8 == 0): no staging, no alias,
    # multi-step grid
    N_al = 512
    big_al = _make_boxes(k_big1, N_al, W, H)
    out_al = jax.block_until_ready(convert_box_pallas(big_al, 1.0 / W, 1.0 / H, True))
    ref_al = _reference(big_al, W, H, convert=True, normalize=True)
    assert jnp.allclose(out_al, ref_al, atol=1e-5, rtol=1e-5)

    # larger, unaligned N: staging pad + in-place alias + partial last block
    N_un = 555
    big_un = _make_boxes(k_big2, N_un, W, H)
    out_un = jax.block_until_ready(convert_box_pallas(big_un, 1.0 / W, 1.0 / H, True))
    ref_un = _reference(big_un, W, H, convert=True, normalize=True)
    assert out_un.shape == (N_un, 4)
    assert jnp.allclose(out_un, ref_un, atol=1e-5, rtol=1e-5)

    print("KERNEL_OK")
</pallas_src>

<mosaic_0001>
module attributes {stable_mosaic.version = 11 : i64} {
  func.func @kernel(%arg0: i32, %arg1: memref<2xf32, #tpu.memory_space<smem>>, %arg2: memref<8x128xf32, #tpu.memory_space<vmem>>, %arg3: memref<8x128xf32, #tpu.memory_space<vmem>>) attributes {dimension_semantics = [#tpu.dimension_semantics<parallel>], iteration_bounds = array<i64: 1>, scalar_prefetch = 0 : i64, scratch_operands = 0 : i64, tpu.core_type = #tpu.core_type<tc>, window_params = [{transform_indices = @transform_0, window_bounds = array<i64: 2>}, {transform_indices = @transform_1, window_bounds = array<i64: 8, 128>}, {transform_indices = @transform_2, window_bounds = array<i64: 8, 128>}]} {
    %c0 = arith.constant 0 : index
    %c0_0 = arith.constant 0 : index
    %0 = vector.load %arg2[%c0, %c0_0] : memref<8x128xf32, #tpu.memory_space<vmem>>, vector<8x128xf32>
    %1 = tpu.iota {dimensions = array<i32: 1>} : vector<8x128xi32>
    %c4_i32 = arith.constant 4 : i32
    %c0_i32 = arith.constant 0 : i32
    %2 = arith.cmpi eq, %c4_i32, %c0_i32 : i32
    %c1_i32 = arith.constant 1 : i32
    %3 = arith.select %2, %c1_i32, %c4_i32 : i32
    %4 = vector.broadcast %3 : i32 to vector<8x128xi32>
    %5 = arith.remsi %1, %4 : vector<8x128xi32>
    %c0_i32_1 = arith.constant 0 : i32
    %6 = vector.broadcast %c0_i32_1 : i32 to vector<8x128xi32>
    %7 = arith.cmpi ne, %5, %6 : vector<8x128xi32>
    %c0_i32_2 = arith.constant 0 : i32
    %8 = vector.broadcast %c0_i32_2 : i32 to vector<8x128xi32>
    %9 = arith.cmpi slt, %5, %8 : vector<8x128xi32>
    %c0_i32_3 = arith.constant 0 : i32
    %10 = arith.cmpi slt, %3, %c0_i32_3 : i32
    %11 = vector.broadcast %10 : i1 to vector<8x128xi1>
    %12 = vector.broadcast %11 : vector<8x128xi1> to vector<8x128xi1>
    %13 = arith.xori %9, %12 : vector<8x128xi1>
    %14 = arith.andi %13, %7 : vector<8x128xi1>
    %15 = vector.broadcast %3 : i32 to vector<8x128xi32>
    %16 = arith.addi %5, %15 : vector<8x128xi32>
    %17 = arith.select %14, %16, %5 : vector<8x128xi1>, vector<8x128xi32>
    %c0_4 = arith.constant 0 : index
    %18 = memref.load %arg1[%c0_4] : memref<2xf32, #tpu.memory_space<smem>>
    %c1 = arith.constant 1 : index
    %19 = memref.load %arg1[%c1] : memref<2xf32, #tpu.memory_space<smem>>
    %c2_i32 = arith.constant 2 : i32
    %c0_i32_5 = arith.constant 0 : i32
    %20 = arith.cmpi eq, %c2_i32, %c0_i32_5 : i32
    %c1_i32_6 = arith.constant 1 : i32
    %21 = arith.select %20, %c1_i32_6, %c2_i32 : i32
    %22 = vector.broadcast %21 : i32 to vector<8x128xi32>
    %23 = arith.remsi %17, %22 : vector<8x128xi32>
    %c0_i32_7 = arith.constant 0 : i32
    %24 = vector.broadcast %c0_i32_7 : i32 to vector<8x128xi32>
    %25 = arith.cmpi ne, %23, %24 : vector<8x128xi32>
    %c0_i32_8 = arith.constant 0 : i32
    %26 = vector.broadcast %c0_i32_8 : i32 to vector<8x128xi32>
    %27 = arith.cmpi slt, %23, %26 : vector<8x128xi32>
    %c0_i32_9 = arith.constant 0 : i32
    %28 = arith.cmpi slt, %21, %c0_i32_9 : i32
    %29 = vector.broadcast %28 : i1 to vector<8x128xi1>
    %30 = vector.broadcast %29 : vector<8x128xi1> to vector<8x128xi1>
    %31 = arith.xori %27, %30 : vector<8x128xi1>
    %32 = arith.andi %31, %25 : vector<8x128xi1>
    %33 = vector.broadcast %21 : i32 to vector<8x128xi32>
    %34 = arith.addi %23, %33 : vector<8x128xi32>
    %35 = arith.select %32, %34, %23 : vector<8x128xi1>, vector<8x128xi32>
    %c0_i32_10 = arith.constant 0 : i32
    %36 = vector.broadcast %c0_i32_10 : i32 to vector<8x128xi32>
    %37 = arith.cmpi eq, %35, %36 : vector<8x128xi32>
    %38 = vector.broadcast %18 : f32 to vector<8x128xf32>
    %39 = vector.broadcast %19 : f32 to vector<8x128xf32>
    %40 = arith.select %37, %38, %39 : vector<8x128xi1>, vector<8x128xf32>
    %c126_i32 = arith.constant 126 : i32
    %41 = tpu.dynamic_rotate %0 by %c126_i32 dim 1 : vector<8x128xf32>, i32 -> vector<8x128xf32>
    %c2_i32_11 = arith.constant 2 : i32
    %42 = tpu.dynamic_rotate %0 by %c2_i32_11 dim 1 : vector<8x128xf32>, i32 -> vector<8x128xf32>
    %c2_i32_12 = arith.constant 2 : i32
    %43 = vector.broadcast %c2_i32_12 : i32 to vector<8x128xi32>
    %44 = arith.cmpi slt, %17, %43 : vector<8x128xi32>
    %45 = arith.addf %0, %41 : vector<8x128xf32>
    %cst = arith.constant 5.000000e-01 : f32
    %46 = vector.broadcast %cst : f32 to vector<8x128xf32>
    %47 = arith.mulf %46, %45 : vector<8x128xf32>
    %48 = arith.subf %0, %42 : vector<8x128xf32>
    %49 = arith.select %44, %47, %48 : vector<8x128xi1>, vector<8x128xf32>
    %50 = arith.mulf %49, %40 : vector<8x128xf32>
    %c0_13 = arith.constant 0 : index
    %c0_14 = arith.constant 0 : index
    %51 = vector.load %arg3[%c0_13, %c0_14] : memref<8x128xf32, #tpu.memory_space<vmem>>, vector<8x128xf32>
    tpu.vector_store %arg3[%c0_13, %c0_14], %50 {strides = array<i32>} : memref<8x128xf32, #tpu.memory_space<vmem>>, vector<8x128xf32>,
    return
  }
  func.func @transform_0(%arg0: i32) -> i32 {
    %c0_i32 = arith.constant 0 : i32
    %c0_i32_0 = arith.constant 0 : i32
    return %c0_i32 : i32
  }
  func.func @transform_1(%arg0: i32) -> (i32, i32) {
    %c0_i32 = arith.constant 0 : i32
    %c0_i32_0 = arith.constant 0 : i32
    return %arg0, %c0_i32 : i32, i32
  }
  func.func @transform_2(%arg0: i32) -> (i32, i32) {
    %c0_i32 = arith.constant 0 : i32
    %c0_i32_0 = arith.constant 0 : i32
    return %arg0, %c0_i32 : i32, i32
  }
}

</mosaic_0001>

<bundles_post_ra>
// kernel: _convert_box_pallas.1
= control target key start
LH: loop header
LB: loop body
LE: loop exit
PB: predicated region body
PF: predicated region fallthrough
CT: control target
= control target key end

     0   :  { %7 = vsyncpa [#allocation3], 0  ;;  %s91_s12 = smov [#allocation2]   ;;  %s118_s0 = inlined_call_operand.vmem [shape: f32[2], index: 0, kind: input, shape index: {}]   ;;  %s119_s1 = inlined_call_operand.vmem [shape: f32[8,128], index: 1, kind: input, shape index: {}, may-alias: {1,2}]   ;;  %s120_s2 = inlined_call_operand.vmem [shape: f32[8,128], index: 2, kind: output, shape index: {}, may-alias: {1,2}]  }
   0x1   :  { %s13_s11 = sshll.u32 %s118_s0, 4  ;;  %s14_s11 = int_to_ptr.vmem [resolvable:$true] %s13_s11 }
   0x2   :  { %16 = dma.vmem_to_smem %s14_s11, 16, %s91_s12, [#allocation3]  }
   0x3   :  { %89 = dma.done.wait [#allocation3], 16  }
   0x4   :  { %90 = vsyncadd [#allocation3], 4294967280 }
   0x5   :  { %23 = sfence }
   0x6   :  { %v24_v0 = vld [vmem:[%s119_s1] sm:$0xff]  ;;  %s92_s15 = smov 126   ;;  %s93_s16 = smov 2   ;;  %v25_v1 = vlaneseq }
   0x7   :  { %57 = vrot.lane.b32.xlu0 %v24_v0, %s92_s15  ;;  %s39_s17 = sld [smem:[#allocation2]] }
   0x8   :  { %v26_v2 = vand.u32 127, %v25_v1  ;;  %s73_s18 = sld [smem:[#allocation2 + $0x1]] }
   0xa   :  { %v31_v3 = vand.u32 3, %v26_v2 }
   0xc   :  { %v45_v5 = vand.u32 1, %v31_v3  ;;  %vm61_vm1 = vcmp.lt.s32.totalorder %v31_v3, 2 }
   0xd   :  { %v54_v7 = vstv %s39_s17 }
   0xe   :  { %vm53_vm0 = vcmp.eq.s32.totalorder %v45_v5, 0  ;;  %v55_v8 = vstv %s73_s18 }
   0xf   :  { %59 = vrot.lane.b32.xlu0 %v24_v0, %s93_s16  ;;  %v56_v11 = vsel %vm53_vm0, %v54_v7, %v55_v8 }
  0x79   :  { %v58_v4 = vpop.permute.xlu0 %57 }
  0x7a   :  { %v62_v6 = vadd.f32 %v58_v4, %v24_v0 }
  0x7c   :  { %v63_v10 = vmul.f32 0.5, %v62_v6 }
  0x81   :  { %v60_v9 = vpop.permute.xlu0 %59 }
  0x82   :  { %v64_v12 = vsub.f32 %v24_v0, %v60_v9 }
  0x84   :  { %v65_v13 = vsel %vm61_vm1, %v63_v10, %v64_v12 }
  0x85   :  { %v66_v14 = vmul.f32 %v65_v13, %v56_v11 }
  0x87   :  { %67 = vst [vmem:[%s120_s2] sm:$0xff] %v66_v14 }
  0x88   :  { %72 = vsyncpa [#allocation3], 1 }

</bundles_post_ra>
